<compile_context>
chip_gen: v7x
topology: tpu7x:2x2x1
jax: 0.10.0
libtpu: 0.0.40
codegen_flags: <defaults>
</compile_context>

<pallas_src>
import jax
import jax.numpy as jnp
from jax import lax
from jax.experimental import pallas as pl
from jax.experimental.pallas import tpu as pltpu


def _conv_as_matmul_kernel(w_ref, col_ref, o_ref):
    # w_ref  : (E, 9*C)      bf16, identical block every step (stays resident)
    # col_ref: (1, 9*C, TS)  bf16 im2col tile, spatial (H*W) on the lane axis
    # o_ref  : (1, E, TS)    f32 output tile (NCHW with H*W flattened on lanes)
    o_ref[0] = jnp.dot(
        w_ref[...], col_ref[0], preferred_element_type=jnp.float32
    ).astype(o_ref.dtype)


def _pick_spatial_tile(s):
    # Lane-dense tiles (multiples of 128); ~8K lanes amortizes the ~0.35us
    # per-grid-step overhead while keeping double-buffered VMEM tiny.
    for ts in (8192, 4096, 2048, 1024, 512, 256, 128):
        if s % ts == 0:
            return ts
    return s  # full extent is always a legal block shape


def overlap_patch_embed(x_nchw, weight_oihw):
    """x_nchw: [B, C, H, W]; weight_oihw: [E, C, 3, 3]. Stride 1, pad 1, no bias."""
    B, C, H, W = x_nchw.shape
    E = weight_oihw.shape[0]
    S = H * W
    K = 9 * C
    TS = _pick_spatial_tile(S)

    # --- wrapper-side im2col in bf16: [B, C, 9, H, W] -> [B, 9C, H*W] --------
    # (input is small: C channels; the big output never gets transposed/copied)
    xb = x_nchw.astype(jnp.bfloat16)
    x_pad = jnp.pad(xb, ((0, 0), (0, 0), (1, 1), (1, 1)))
    taps = [
        x_pad[:, :, dy:dy + H, dx:dx + W]          # shifted (B, C, H, W) views
        for dy in range(3)
        for dx in range(3)
    ]
    col = jnp.stack(taps, axis=2).reshape(B, K, S)  # k-index = c*9 + dy*3 + dx

    # Weight [E, C, 3, 3] -> [E, 9C]; row-major reshape matches the col order.
    w2 = weight_oihw.reshape(E, K).astype(jnp.bfloat16)

    out_flat = pl.pallas_call(
        _conv_as_matmul_kernel,
        out_shape=jax.ShapeDtypeStruct((B, E, S), jnp.float32),
        grid_spec=pltpu.PrefetchScalarGridSpec(
            num_scalar_prefetch=0,
            grid=(B, S // TS),
            in_specs=[
                pl.BlockSpec((E, K), lambda b, s: (0, 0)),
                pl.BlockSpec((1, K, TS), lambda b, s: (b, 0, s)),
            ],
            out_specs=pl.BlockSpec((1, E, TS), lambda b, s: (b, 0, s)),
        ),
        compiler_params=pltpu.CompilerParams(
            dimension_semantics=("parallel", "parallel"),
            vmem_limit_bytes=32 * 1024 * 1024,
        ),
    )(w2, col)

    # Free (row-major) reshape back to NCHW — no transpose pass.
    return out_flat.reshape(B, E, H, W).astype(x_nchw.dtype)


if __name__ == "__main__":
    # Module defaults: in_c=3, embed_dim=32, kernel 3x3, stride 1, pad 1, no bias.
    B, C, H, W = 2, 3, 16, 16
    E = 32

    key = jax.random.PRNGKey(0)
    kx, kw = jax.random.split(key)
    x = jax.random.normal(kx, (B, C, H, W), dtype=jnp.float32)
    weight = jax.random.normal(kw, (E, C, 3, 3), dtype=jnp.float32) * 0.1

    fwd = jax.jit(overlap_patch_embed)
    out = jax.block_until_ready(fwd(x, weight))

    # Reference conv on bf16-rounded inputs (the kernel uses bf16 operands with
    # f32 accumulation), so only accumulation-order differences remain.
    x_r = x.astype(jnp.bfloat16).astype(jnp.float32)
    w_r = weight.astype(jnp.bfloat16).astype(jnp.float32)
    ref = lax.conv_general_dilated(
        x_r, w_r, window_strides=(1, 1), padding="SAME",
        dimension_numbers=("NCHW", "OIHW", "NCHW"),
    )
    assert out.shape == (B, E, H, W), out.shape
    max_err = float(jnp.max(jnp.abs(out - ref)))
    assert jnp.allclose(out, ref, atol=5e-3, rtol=5e-3), max_err

    print("KERNEL_OK")
</pallas_src>

<mosaic_0001>
module attributes {stable_mosaic.version = 11 : i64} {
  func.func @_conv_as_matmul_kernel(%arg0: i32, %arg1: i32, %arg2: memref<32x27xbf16, #tpu.memory_space<vmem>>, %arg3: memref<1x27x256xbf16, #tpu.memory_space<vmem>>, %arg4: memref<1x32x256xf32, #tpu.memory_space<vmem>>) attributes {dimension_semantics = [#tpu.dimension_semantics<parallel>, #tpu.dimension_semantics<parallel>], iteration_bounds = array<i64: 2, 1>, scalar_prefetch = 0 : i64, scratch_operands = 0 : i64, tpu.core_type = #tpu.core_type<tc>, window_params = [{pipeline_mode = #tpu.pipeline_mode<synchronous>, transform_indices = @transform_0, window_bounds = array<i64: 32, 27>}, {transform_indices = @transform_1, window_bounds = array<i64: 1, 27, 256>}, {transform_indices = @transform_2, window_bounds = array<i64: 1, 32, 256>}]} {
    %c0 = arith.constant 0 : index
    %c0_0 = arith.constant 0 : index
    %0 = vector.load %arg2[%c0, %c0_0] : memref<32x27xbf16, #tpu.memory_space<vmem>>, vector<32x27xbf16>
    %c0_1 = arith.constant 0 : index
    %c0_2 = arith.constant 0 : index
    %c0_3 = arith.constant 0 : index
    %1 = vector.load %arg3[%c0_1, %c0_2, %c0_3] : memref<1x27x256xbf16, #tpu.memory_space<vmem>>, vector<1x27x256xbf16>
    %2 = vector.shape_cast %1 : vector<1x27x256xbf16> to vector<27x256xbf16>
    %cst = arith.constant dense<0.000000e+00> : vector<32x256xf32>
    %3 = tpu.matmul %0, %2, %cst {dimension_numbers = #tpu.dot_dimension_numbers<[1], [0], [0], [1], [0, 0, 1, 1], [], []>} : vector<32x27xbf16>, vector<27x256xbf16>, vector<32x256xf32> -> vector<32x256xf32>
    %c0_4 = arith.constant 0 : index
    %c0_5 = arith.constant 0 : index
    %c0_6 = arith.constant 0 : index
    %4 = vector.load %arg4[%c0_4, %c0_5, %c0_6] : memref<1x32x256xf32, #tpu.memory_space<vmem>>, vector<1x32x256xf32>
    %5 = vector.shape_cast %4 : vector<1x32x256xf32> to vector<32x256xf32>
    %6 = vector.shape_cast %3 : vector<32x256xf32> to vector<1x32x256xf32>
    tpu.vector_store %arg4[%c0_4, %c0_5, %c0_6], %6 {strides = array<i32>} : memref<1x32x256xf32, #tpu.memory_space<vmem>>, vector<1x32x256xf32>,
    return
  }
  func.func @transform_0(%arg0: i32, %arg1: i32) -> (i32, i32) {
    %c0_i32 = arith.constant 0 : i32
    %c0_i32_0 = arith.constant 0 : i32
    %c0_i32_1 = arith.constant 0 : i32
    return %c0_i32, %c0_i32_0 : i32, i32
  }
  func.func @transform_1(%arg0: i32, %arg1: i32) -> (i32, i32, i32) {
    %c0_i32 = arith.constant 0 : i32
    %c0_i32_0 = arith.constant 0 : i32
    return %arg0, %c0_i32, %arg1 : i32, i32, i32
  }
  func.func @transform_2(%arg0: i32, %arg1: i32) -> (i32, i32, i32) {
    %c0_i32 = arith.constant 0 : i32
    %c0_i32_0 = arith.constant 0 : i32
    return %arg0, %c0_i32, %arg1 : i32, i32, i32
  }
}

</mosaic_0001>

<bundles_post_ra>
// kernel: overlap_patch_embed.1
= control target key start
LH: loop header
LB: loop body
LE: loop exit
PB: predicated region body
PF: predicated region fallthrough
CT: control target
= control target key end

     0   :  { %s485_s9 = smov 0   ;;  %s487_s10 = smov 0   ;;  %s524_s0 = inlined_call_operand.vmem [shape: bf16[32,27], index: 0, kind: input, shape index: {}]   ;;  %s525_s1 = inlined_call_operand.vmem [shape: bf16[2,27,256], index: 1, kind: input, shape index: {}]   ;;  %s526_s2 = inlined_call_operand.vmem [shape: f32[2,32,256], index: 2, kind: output, shape index: {}]  }
   0x1   :  { %s489_s11 = smov 0  }
   0x2 LB: > { %s24_s12 = sadd.s32 1, %s462_s10  ;;  %p389_p0 = scmp.ge.s32.totalorder %s466_s11, 1  ;;  %s466_s11 = sphi %s489_s11, %s12_s11   ;;  %s462_s10 = sphi %s487_s10, %s528_s10   ;;  %s458_s9 = sphi %s485_s9, %s527_s9  }
   0x3   : > { %p26_p1 = scmp.ge.s32.totalorder %s24_s12, 2  ;;  %p133_p2 = scmp.lt.s32.totalorder %s466_s11, 3 }
   0x5   : > { %s530_s12 = smov (%p26_p1, %s24_s12), 0  ;;  %p134_p3 = pnand %p389_p0, %p133_p2 }
   0x6   : > { %p164_p4 = scmp.lt.s32.totalorder (!%p134_p3), %s458_s9, 1  ;;  %vm227_vm0 = vcmask (!%p134_p3), 1044480   ;;  %v468_v0 = vmov (!%p134_p3), 0   ;;  %vm228_vm1 = vcmask (!%p134_p3), 1045504   ;;  %v469_v1 = vmov (!%p134_p3), 65535   ;;  %v442_v10 = vld [vmem:[%s524_s0] sm:$0xff] (!%p134_p3)  }
   0x7   : > { %137 = sbr.rel (%p134_p3) target bundleno = 242 (0xf2), region = 28  ;;  %269 = vmatprep.mubr.bf16.mxu0 (!%p134_p3), %v468_v0  ;;  %279 = vmatprep.mubr.bf16.mxu1 (!%p134_p3), %v468_v0  ;;  %v229_v2 = vsel (!%p134_p3), %vm227_vm0, 4294967295, %v469_v1  ;;  %v443_v11 = vld [vmem:[%s524_s0 + $0x8] sm:$0xff] (!%p134_p3)   ;;  %vm220_vm2 = vcmask (!%p134_p3), 220160  }
   0x8   : > { %v230_v5 = vsel (!%p134_p3), %vm228_vm1, %v229_v2, 0 }
   0xe   : > { %s532_s9 = smov (!%p164_p4, %s458_s9), 1 }
   0xf   : > { %s404_s13 = sshll.u32 %s532_s9, 5  ;;  %s405_s21 = sshll.u32 %s532_s9, 6 }
  0x10   : > { %s171_s16 = scalar_lea.vmem %s525_s1, %s404_s13  ;;  %s181_s24 = scalar_lea.vmem %s526_s2, %s405_s21 }
  0x11   : > { %v436_v3 = vld [vmem:[%s171_s16 + $0x4] ss:$8 sps:$4 sm:$0xff]   ;;  %v438_v4 = vld [vmem:[%s171_s16] ss:$8 sps:$4 sm:$0xff]  }
  0x12   : > { %237 = vmatprep.subr.bf16.mxu0 %v436_v3  ;;  %406 = vmatprep.subr.bf16.mxu1 %v436_v3  ;;  %v439_v6 = vld [vmem:[%s171_s16 + $0x14] ss:$8 sps:$4 sm:$0x3f]   ;;  %v441_v7 = vld [vmem:[%s171_s16 + $0x10] ss:$8 sps:$4 sm:$0x3f]  }
  0x13   : > { %238 = vmatpush1.bf16.msra.mxu0 %v438_v4  ;;  %408 = vmatpush1.bf16.msra.mxu1 %v438_v4  ;;  %v235_v8 = vand.u32 %v439_v6, %v230_v5  ;;  %v232_v9 = vand.u32 %v441_v7, %v230_v5 }
  0x15   : > { %239 = vmatprep.subr.bf16.mxu0 %v235_v8  ;;  %407 = vmatprep.subr.bf16.mxu1 %v235_v8 }
  0x17   : > { %240 = vmatpush1.bf16.msra.mxu0 %v232_v9  ;;  %409 = vmatpush1.bf16.msra.mxu1 %v232_v9 }
  0x1a   : > { %400 = vmatmul.mubr.msk.bf16.vlgmr.msra.gmra.mrb[0].mxu0 %vm220_vm2, %v442_v10  ;;  %401 = vmatmul.mubr.msk.bf16.vlgmr.msra.gmra.mrb[0].mxu1 %vm220_vm2, %v443_v11 }
  0xed   : > { %v271_v12 = vpop.f32.mrb[0].mxu0  ;;  %v281_v13 = vpop.f32.mrb[0].mxu1 }
  0xee   : > { %290 = vst [vmem:[%s181_s24] sm:$0xff] %v271_v12  ;;  %294 = vst [vmem:[%s181_s24 + $0x20] sm:$0xff] %v281_v13  ;;  %v273_v14 = vpop.f32.mrb[1].mxu0  ;;  %v283_v15 = vpop.f32.mrb[1].mxu1 }
  0xef   : > { %291 = vst [vmem:[%s181_s24 + $0x8] sm:$0xff] %v273_v14  ;;  %295 = vst [vmem:[%s181_s24 + $0x28] sm:$0xff] %v283_v15  ;;  %v275_v16 = vpop.f32.mrb[2].mxu0  ;;  %v285_v17 = vpop.f32.mrb[2].mxu1 }
  0xf0   : > { %292 = vst [vmem:[%s181_s24 + $0x10] sm:$0xff] %v275_v16  ;;  %296 = vst [vmem:[%s181_s24 + $0x30] sm:$0xff] %v285_v17  ;;  %v277_v18 = vpop.f32.mrb[3].mxu0  ;;  %v287_v19 = vpop.f32.mrb[3].mxu1 }
  0xf1   : > { %293 = vst [vmem:[%s181_s24 + $0x18] sm:$0xff] %v277_v18  ;;  %297 = vst [vmem:[%s181_s24 + $0x38] sm:$0xff] %v287_v19 }
  0xf2 PF: > { %s12_s11 = sadd.s32 1, %s466_s11   ;;  %s527_s9 = smov %s462_s10 }
  0xf3   : > { %p9_p5 = scmp.ge.s32.totalorder %s12_s11, 4   ;;  %s528_s10 = smov %s530_s12 }
  0xf5   :  { %11 = sbr.rel (!%p9_p5) target bundleno = 2 (0x2), region = 58 }

</bundles_post_ra>
